<compile_context>
chip_gen: v7x
topology: tpu7x:2x2x1
jax: 0.10.0
libtpu: 0.0.40
codegen_flags: <defaults>
</compile_context>

<pallas_src>
import jax
import jax.numpy as jnp
from jax.experimental import pallas as pl
from jax.experimental.pallas import tpu as pltpu

N = 4  # square matrix size implied by the module


def _model_kernel(slab_ref, o_ref):
    f32 = jnp.float32
    # slab layout: [x, w1, w2, t3] along the leading axis — clean, offset-0
    # aligned (N, N) reads, no lane/sublane re-alignment needed.
    x = slab_ref[0].astype(f32)
    w1 = slab_ref[1].astype(f32)
    w2 = slab_ref[2].astype(f32)
    t3 = slab_ref[3].astype(f32)  # = w3 @ w3, precomputed in the wrapper

    # ---- Dependency-free MXU pushes first (back-to-back on the MXU) -------
    t1 = jnp.dot(x, w1, preferred_element_type=f32)
    t2 = jnp.dot(x, w2, preferred_element_type=f32)

    # ---- Dependent MXU pushes ----------------------------------------------
    t5 = t1 * w1
    t1x = jnp.dot(t1, x, preferred_element_type=f32)   # feeds t12
    t5x = jnp.dot(t5, x, preferred_element_type=f32)   # feeds t6

    # ---- VPU elementwise tail ----------------------------------------------
    t6 = t5x * w1
    t7 = t1 * t2 + t1 + t3
    # t4 == t2 exactly  =>  t8 == 0  =>  t9 = t7*t8 + t6*t3 = t6*t3
    t9 = t6 * t3
    t11 = t3 * t9
    t12 = t3 * t1x * t6
    # t13 = t7 + t11 ; t14 = t8 + t12 = t12 ; t15 = t13 + t14
    o_ref[...] = (t7 + t11 + t12).astype(o_ref.dtype)


@jax.jit
def model_forward(x, w1, w2, w3):
    """Single no-grid Pallas invocation; all operands packed into ONE input DMA."""
    # Weight-only work hoisted out of the per-call kernel path.
    t3 = jnp.dot(w3, w3, preferred_element_type=jnp.float32)
    slab = jnp.stack(
        [x.astype(jnp.float32), w1.astype(jnp.float32),
         w2.astype(jnp.float32), t3]
    )  # (4, N, N) -> a single contiguous HBM->VMEM DMA

    slab_spec = pl.BlockSpec(
        (4, N, N), lambda: (0, 0, 0), memory_space=pltpu.MemorySpace.VMEM
    )
    out_spec = pl.BlockSpec(
        (N, N), lambda: (0, 0), memory_space=pltpu.MemorySpace.VMEM
    )
    return pl.pallas_call(
        _model_kernel,
        out_shape=jax.ShapeDtypeStruct((N, N), jnp.float32),
        in_specs=[slab_spec],
        out_specs=out_spec,
        cost_estimate=pl.CostEstimate(
            flops=4 * 2 * N * N * N,          # 4 in-kernel (4,4)x(4,4) matmuls
            transcendentals=0,
            bytes_accessed=5 * 8 * 128 * 4,   # 5 padded (8,128) f32 tiles moved
        ),
    )(slab)


def _reference(x, w1, w2, w3):
    # Pure-JAX replica of the ORIGINAL (unsimplified) PyTorch forward graph.
    t1 = x @ w1
    t2 = x @ w2
    t3 = w3 @ w3
    t4 = x @ w2
    t5 = t1 * w1
    t6 = (t5 @ x) * w1
    t7 = t1 * t2 + t1 + t3
    t8 = t2 - t4
    t9 = t7 * t8 + t6 * t3
    t11 = t3 * t9
    t12 = t3 * (t1 @ x) * t6
    t13 = t7 + t11
    t14 = t8 + t12
    return t13 + t14


if __name__ == "__main__":
    key = jax.random.PRNGKey(0)
    k_in, k_w1, k_w2, k_w3 = jax.random.split(key, 4)

    x = jax.random.normal(k_in, (N, N), dtype=jnp.float32)
    w1 = jax.random.normal(k_w1, (N, N), dtype=jnp.float32)
    w2 = jax.random.normal(k_w2, (N, N), dtype=jnp.float32)
    w3 = jax.random.normal(k_w3, (N, N), dtype=jnp.float32)

    out = model_forward(x, w1, w2, w3)
    jax.block_until_ready(out)

    ref = _reference(x, w1, w2, w3)
    assert jnp.allclose(out, ref, atol=1e-4, rtol=1e-4), "mismatch vs reference"

    print("KERNEL_OK")
</pallas_src>

<mosaic_0001>
module attributes {stable_mosaic.version = 11 : i64} {
  func.func @_model_kernel(%arg0: memref<4x4x4xf32, #tpu.memory_space<vmem>>, %arg1: memref<4x4xf32, #tpu.memory_space<vmem>>) attributes {dimension_semantics = [], scalar_prefetch = 0 : i64, scratch_operands = 0 : i64, tpu.core_type = #tpu.core_type<tc>} {
    %c0 = arith.constant 0 : index
    %c0_0 = arith.constant 0 : index
    %c0_1 = arith.constant 0 : index
    %0 = vector.load %arg0[%c0, %c0_0, %c0_1] : memref<4x4x4xf32, #tpu.memory_space<vmem>>, vector<1x4x4xf32>
    %1 = vector.shape_cast %0 : vector<1x4x4xf32> to vector<4x4xf32>
    %c1 = arith.constant 1 : index
    %c0_2 = arith.constant 0 : index
    %c0_3 = arith.constant 0 : index
    %2 = vector.load %arg0[%c1, %c0_2, %c0_3] : memref<4x4x4xf32, #tpu.memory_space<vmem>>, vector<1x4x4xf32>
    %3 = vector.shape_cast %2 : vector<1x4x4xf32> to vector<4x4xf32>
    %c2 = arith.constant 2 : index
    %c0_4 = arith.constant 0 : index
    %c0_5 = arith.constant 0 : index
    %4 = vector.load %arg0[%c2, %c0_4, %c0_5] : memref<4x4x4xf32, #tpu.memory_space<vmem>>, vector<1x4x4xf32>
    %5 = vector.shape_cast %4 : vector<1x4x4xf32> to vector<4x4xf32>
    %c3 = arith.constant 3 : index
    %c0_6 = arith.constant 0 : index
    %c0_7 = arith.constant 0 : index
    %6 = vector.load %arg0[%c3, %c0_6, %c0_7] : memref<4x4x4xf32, #tpu.memory_space<vmem>>, vector<1x4x4xf32>
    %7 = vector.shape_cast %6 : vector<1x4x4xf32> to vector<4x4xf32>
    %cst = arith.constant dense<0.000000e+00> : vector<4x4xf32>
    %8 = tpu.matmul %1, %3, %cst {dimension_numbers = #tpu.dot_dimension_numbers<[1], [0], [0], [1], [0, 0, 1, 1], [], []>} : vector<4x4xf32>, vector<4x4xf32>, vector<4x4xf32> -> vector<4x4xf32>
    %cst_8 = arith.constant dense<0.000000e+00> : vector<4x4xf32>
    %9 = tpu.matmul %1, %5, %cst_8 {dimension_numbers = #tpu.dot_dimension_numbers<[1], [0], [0], [1], [0, 0, 1, 1], [], []>} : vector<4x4xf32>, vector<4x4xf32>, vector<4x4xf32> -> vector<4x4xf32>
    %10 = arith.mulf %8, %3 : vector<4x4xf32>
    %cst_9 = arith.constant dense<0.000000e+00> : vector<4x4xf32>
    %11 = tpu.matmul %8, %1, %cst_9 {dimension_numbers = #tpu.dot_dimension_numbers<[1], [0], [0], [1], [0, 0, 1, 1], [], []>} : vector<4x4xf32>, vector<4x4xf32>, vector<4x4xf32> -> vector<4x4xf32>
    %cst_10 = arith.constant dense<0.000000e+00> : vector<4x4xf32>
    %12 = tpu.matmul %10, %1, %cst_10 {dimension_numbers = #tpu.dot_dimension_numbers<[1], [0], [0], [1], [0, 0, 1, 1], [], []>} : vector<4x4xf32>, vector<4x4xf32>, vector<4x4xf32> -> vector<4x4xf32>
    %13 = arith.mulf %12, %3 : vector<4x4xf32>
    %14 = arith.mulf %8, %9 : vector<4x4xf32>
    %15 = arith.addf %14, %8 : vector<4x4xf32>
    %16 = arith.addf %15, %7 : vector<4x4xf32>
    %17 = arith.mulf %13, %7 : vector<4x4xf32>
    %18 = arith.mulf %7, %17 : vector<4x4xf32>
    %19 = arith.mulf %7, %11 : vector<4x4xf32>
    %20 = arith.mulf %19, %13 : vector<4x4xf32>
    %21 = arith.addf %16, %18 : vector<4x4xf32>
    %22 = arith.addf %21, %20 : vector<4x4xf32>
    %c0_11 = arith.constant 0 : index
    %c0_12 = arith.constant 0 : index
    %23 = vector.load %arg1[%c0_11, %c0_12] : memref<4x4xf32, #tpu.memory_space<vmem>>, vector<4x4xf32>
    tpu.vector_store %arg1[%c0_11, %c0_12], %22 {strides = array<i32>} : memref<4x4xf32, #tpu.memory_space<vmem>>, vector<4x4xf32>,
    return
  }
}

</mosaic_0001>

<bundles_post_ra>
// kernel: model_forward.1
= control target key start
LH: loop header
LB: loop body
LE: loop exit
PB: predicated region body
PF: predicated region fallthrough
CT: control target
= control target key end

     0   :  { %vm20_vm0 = vcmask 1043456   ;;  %vm16_vm1 = vcmask 31744   ;;  %v408_v1 = vmov 0.0   ;;  %s453_s0 = inlined_call_operand.vmem [shape: f32[4,4,4], index: 0, kind: input, shape index: {}]   ;;  %s454_s1 = inlined_call_operand.hbm [shape: f32[4,4], index: 1, kind: output, shape index: {}]  }
   0x1   :  { %v342_v0 = vld [vmem:[%s453_s0 + $0x4] sm:$0xf]  ;;  %361 = vmatprep.subr.mxu0 %v408_v1  ;;  %366 = vmatprep.subr.mxu1 %v408_v1  ;;  %v343_v2 = vld [vmem:[%s453_s0 + $0x8] sm:$0xf]  ;;  %v9_v3 = vld [vmem:[%s453_s0] sm:$0xf] }
   0x2   :  { %6 = vsyncpa [#allocation3], 0  ;;  %362 = vmatpush3.msk.msra.mxu0 %vm20_vm0, %v342_v0  ;;  %vm409_vm2 = vmmov 0   ;;  %367 = vmatpush3.msk.msra.mxu1 %vm20_vm0, %v343_v2  ;;  %v344_v13 = vld [vmem:[%s453_s0 + $0xc] sm:$0xf]  ;;  %s410_s14 = smov [#allocation2]  }
   0x3   :  { %363 = vmatprep.mubr.msk.f32.mxu0 %vm409_vm2, %v408_v1  ;;  %368 = vmatprep.mubr.msk.f32.mxu1 %vm409_vm2, %v408_v1  ;;  %s334_s15 = sshll.u32 %s410_s14, 4  ;;  %vm326_vm3 = vcmask 27648   ;;  %s335_s15 = int_to_ptr.vmem [resolvable:$true] %s334_s15 }
   0x4   :  { %364 = vmatmul.mubr.msk.f32.vlgmr.msra.gmra.mrb[0].mxu0 %vm16_vm1, %v9_v3  ;;  %369 = vmatmul.mubr.msk.f32.vlgmr.msra.gmra.mrb[0].mxu1 %vm16_vm1, %v9_v3  ;;  %s384_s16 = scalar_lea.vmem %s335_s15, 64  ;;  %p389_p1 = scmp.lt.s32.totalorder %s335_s15, %s335_s15 }
   0x5   :  { %376 = vmatprep.subr.mxu1 %v408_v1  ;;  %371 = vmatprep.subr.mxu0 %v408_v1  ;;  %p385_p0 = scmp.ne.s32.totalorder %s335_s15, %s384_s16  ;;  %p390_p2 = scmp.lt.s32.totalorder %s384_s16, %s384_s16 }
   0x6   :  { %377 = vmatpush3.msk.msra.mxu1 %vm20_vm0, %v9_v3  ;;  %372 = vmatpush3.msk.msra.mxu0 %vm20_vm0, %v9_v3 }
   0x7   :  { %373 = vmatprep.mubr.msk.f32.mxu0 %vm409_vm2, %v408_v1  ;;  %378 = vmatprep.mubr.msk.f32.mxu1 %vm409_vm2, %v408_v1  ;;  %p391_p3 = por %p390_p2, %p389_p1 }
   0x9   :  { %p392_p4 = pnand %p391_p3, %p385_p0 }
  0xd7   :  { %v90_v4 = vpop.f32.mrb[0].mxu0  ;;  %v163_v5 = vpop.f32.mrb[0].mxu1 }
  0xd8   :  { %v167_v6 = vmul.f32 %v342_v0, %v90_v4  ;;  %v317_v7 = vmul.f32 %v163_v5, %v90_v4  ;;  %v365_v8 = vpop.f32.mrb[1].mxu0  ;;  %374 = vmatmul.mubr.msk.f32.vlgmr.msra.gmra.mrb[2].mxu0 %vm16_vm1, %v90_v4  ;;  %v370_v9 = vpop.f32.mrb[1].mxu1 }
  0xda   :  { %v318_v10 = vadd.f32 %v317_v7, %v90_v4  ;;  %379 = vmatmul.mubr.msk.f32.vlgmr.msra.gmra.mrb[2].mxu1 %vm16_vm1, %v167_v6 }
  0xdc   :  { %v319_v20 = vadd.f32 %v344_v13, %v318_v10 }
 0x1ab   :  { %v239_v11 = vpop.f32.mrb[2].mxu0 }
 0x1ac   :  { %v375_v12 = vpop.f32.mrb[3].mxu0  ;;  %v322_v15 = vmul.f32 %v344_v13, %v239_v11 }
 0x1ad   :  { %v312_v14 = vpop.f32.mrb[2].mxu1 }
 0x1ae   :  { %v316_v16 = vmul.f32 %v342_v0, %v312_v14  ;;  %v380_v17 = vpop.f32.mrb[3].mxu1 }
 0x1b0   :  { %v320_v18 = vmul.f32 %v344_v13, %v316_v16  ;;  %v323_v19 = vmul.f32 %v322_v15, %v316_v16 }
 0x1b2   :  { %v321_v21 = vmul.f32 %v344_v13, %v320_v18 }
 0x1b4   :  { %v324_v22 = vadd.f32 %v321_v21, %v319_v20 }
 0x1b6   :  { %v325_v23 = vadd.f32 %v324_v22, %v323_v19 }
 0x1b8   :  { %327 = vst.msk [vmem:[#allocation2] sm:$0xf] %vm326_vm3, %v325_v23 }
 0x1b9   :  { %395 = shalt.err (!%p392_p4)
}
 0x1ba   :  { %s396_s18 = scalar_lea.hbm %s454_s1, 64 }
 0x1bb   :  { %p397_p5 = scmp.ne.s32.totalorder %s454_s1, %s396_s18  ;;  %p400_p6 = scmp.lt.u32.totalorder %s396_s18, %s454_s1 }
 0x1bd   :  { %p402_p7 = pnand %p400_p6, %p397_p5 }
 0x1bf   :  { %405 = shalt.err (!%p402_p7)
}
 0x1c0   :  { %337 = dma.vmem_to_hbm [thread:$0]  %s335_s15, 64, %s454_s1, [#allocation3]  }
 0x1c1   :  { %406 = dma.done.wait [#allocation3], 64  }
 0x1c2   :  { %407 = vsyncadd [#allocation3], 4294967232 }
 0x1c3   :  { %341 = vsyncpa [#allocation3], 1 }

</bundles_post_ra>
